<compile_context>
chip_gen: v5e
topology: v5e:2x2
jax: 0.10.0
libtpu: 0.0.40
codegen_flags: <defaults>
</compile_context>

<pallas_src>
import functools

import jax
import jax.numpy as jnp
from jax.experimental import pallas as pl
from jax.experimental.pallas import tpu as pltpu

LANES = 128
MAX_TILE_ROWS = 2048  # (2048, 128) f32 block = 1 MiB; 2 inputs x 2 buffers = 4 MiB VMEM.


def _mape_block_kernel(n_elems, tile_rows, p_ref, l_ref, o_ref):
    # Upcast in-kernel (free under the DMA); keeps HBM traffic at input width.
    p = p_ref[...].astype(jnp.float32)
    l = l_ref[...].astype(jnp.float32)

    loss = jnp.abs((p - l) / l)

    # torch.nan_to_num (f32 defaults): NaN -> 0, +inf -> finfo.max.
    loss = jnp.where(jnp.isnan(loss), jnp.float32(0.0), loss)
    loss = jnp.minimum(loss, jnp.finfo(jnp.float32).max)

    # Mask elements past the true end of the data (partial last block reads
    # undefined values — Pallas does not zero OOB reads).
    # NOTE: int32 indexing is fine up to ~2.1e9 elements.
    base = pl.program_id(0) * (tile_rows * LANES)
    row_ids = jax.lax.broadcasted_iota(jnp.int32, (tile_rows, LANES), 0)
    lane_ids = jax.lax.broadcasted_iota(jnp.int32, (tile_rows, LANES), 1)
    idx = base + row_ids * LANES + lane_ids
    loss = jnp.where(idx < n_elems, loss, jnp.float32(0.0))

    # Per-lane partial sum: reduction over rows only (VPU vreg adds, no
    # serial carried accumulator), written as a lane-dense (1, 128) row.
    o_ref[...] = jnp.sum(loss, axis=0, keepdims=True)


def mape(preds: jax.Array, labels: jax.Array) -> jax.Array:
    """Returns scalar MAPE, matching the PyTorch module's forward."""
    assert preds.shape == labels.shape
    n = preds.size

    p_flat = preds.reshape(-1)
    l_flat = labels.reshape(-1)

    # Pad only the ragged <128-element tail so the flat array reshapes into a
    # (rows, 128) slab.  When numel is 128-aligned (common case) this is a
    # no-op and no copy is made.  Padded values are masked in-kernel anyway.
    pad = (-n) % LANES
    if pad:
        p_flat = jnp.pad(p_flat, (0, pad), constant_values=1)
        l_flat = jnp.pad(l_flat, (0, pad), constant_values=1)

    rows = (n + pad) // LANES
    p2 = p_flat.reshape(rows, LANES)
    l2 = l_flat.reshape(rows, LANES)

    # Block row-count: as large as MAX_TILE_ROWS, rounded to the sublane
    # granularity (multiple of 8).  A partial/oversized last block is handled
    # by the in-kernel mask.
    tile_rows = min(MAX_TILE_ROWS, ((rows + 7) // 8) * 8)
    num_blocks = pl.cdiv(rows, tile_rows)

    partial = pl.pallas_call(
        functools.partial(_mape_block_kernel, n, tile_rows),
        out_shape=jax.ShapeDtypeStruct((num_blocks, LANES), jnp.float32),
        grid=(num_blocks,),
        in_specs=[
            pl.BlockSpec((tile_rows, LANES), lambda i: (i, 0)),
            pl.BlockSpec((tile_rows, LANES), lambda i: (i, 0)),
        ],
        out_specs=pl.BlockSpec((1, LANES), lambda i: (i, 0)),
        compiler_params=pltpu.CompilerParams(
            dimension_semantics=("parallel",)  # row-block axis shards across TCs on v7x
        ),
    )(p2, l2)

    # Tiny final reduction (num_blocks x 128 scalars) + mean in plain JAX.
    return jnp.sum(partial) / jnp.float32(n)


if __name__ == "__main__":
    key = jax.random.PRNGKey(0)
    k1, k2 = jax.random.split(key)

    # Small shapes consistent with a prediction/label pair, e.g. (B, C, H, W).
    shape = (2, 4, 16, 16)
    preds = jax.random.normal(k1, shape, dtype=jnp.float32)
    labels = jax.random.normal(k2, shape, dtype=jnp.float32)
    # Inject a zero label to exercise the nan_to_num path (inf -> finfo.max).
    labels = labels.at[0, 0, 0, 0].set(0.0)

    result = mape(preds, labels)
    jax.block_until_ready(result)

    # Reference check in plain JAX (mirrors torch semantics).
    ref_loss = jnp.abs((preds - labels) / labels)
    finfo = jnp.finfo(jnp.float32)
    ref_loss = jnp.where(jnp.isnan(ref_loss), 0.0, ref_loss)
    ref_loss = jnp.where(ref_loss == jnp.inf, finfo.max, ref_loss)
    ref_loss = jnp.where(ref_loss == -jnp.inf, finfo.min, ref_loss)
    ref = jnp.mean(ref_loss)

    assert jnp.allclose(result, ref, rtol=1e-5, atol=1e-5), (result, ref)
    print("KERNEL_OK")
</pallas_src>

<mosaic_0001>
module attributes {stable_mosaic.version = 11 : i64} {
  func.func @_mape_block_kernel(%arg0: i32, %arg1: memref<16x128xf32, #tpu.memory_space<vmem>>, %arg2: memref<16x128xf32, #tpu.memory_space<vmem>>, %arg3: memref<1x128xf32, #tpu.memory_space<vmem>>) attributes {dimension_semantics = [#tpu.dimension_semantics<parallel>], iteration_bounds = array<i64: 1>, scalar_prefetch = 0 : i64, scratch_operands = 0 : i64, tpu.core_type = #tpu.core_type<tc>, window_params = [{transform_indices = @transform_0, window_bounds = array<i64: 16, 128>}, {transform_indices = @transform_1, window_bounds = array<i64: 16, 128>}, {transform_indices = @transform_2, window_bounds = array<i64: 1, 128>}]} {
    %c0 = arith.constant 0 : index
    %c0_0 = arith.constant 0 : index
    %0 = vector.load %arg1[%c0, %c0_0] : memref<16x128xf32, #tpu.memory_space<vmem>>, vector<16x128xf32>
    %c0_1 = arith.constant 0 : index
    %c0_2 = arith.constant 0 : index
    %1 = vector.load %arg2[%c0_1, %c0_2] : memref<16x128xf32, #tpu.memory_space<vmem>>, vector<16x128xf32>
    %2 = arith.subf %0, %1 : vector<16x128xf32>
    %3 = arith.divf %2, %1 : vector<16x128xf32>
    %4 = math.absf %3 : vector<16x128xf32>
    %5 = arith.cmpf one, %4, %4 : vector<16x128xf32>
    %cst = arith.constant 0.000000e+00 : f32
    %6 = vector.broadcast %cst : f32 to vector<16x128xf32>
    %7 = arith.select %5, %6, %4 : vector<16x128xi1>, vector<16x128xf32>
    %cst_3 = arith.constant 3.40282347E+38 : f32
    %8 = vector.broadcast %cst_3 : f32 to vector<16x128xf32>
    %9 = arith.minimumf %7, %8 : vector<16x128xf32>
    %c2048_i32 = arith.constant 2048 : i32
    %10 = arith.muli %arg0, %c2048_i32 : i32
    %11 = tpu.iota {dimensions = array<i32: 0>} : vector<16x128xi32>
    %12 = tpu.iota {dimensions = array<i32: 1>} : vector<16x128xi32>
    %c128_i32 = arith.constant 128 : i32
    %13 = vector.broadcast %c128_i32 : i32 to vector<16x128xi32>
    %14 = arith.muli %11, %13 : vector<16x128xi32>
    %15 = vector.broadcast %10 : i32 to vector<16x128xi32>
    %16 = arith.addi %15, %14 : vector<16x128xi32>
    %17 = arith.addi %16, %12 : vector<16x128xi32>
    %c2048_i32_4 = arith.constant 2048 : i32
    %18 = vector.broadcast %c2048_i32_4 : i32 to vector<16x128xi32>
    %19 = arith.cmpi slt, %17, %18 : vector<16x128xi32>
    %cst_5 = arith.constant 0.000000e+00 : f32
    %20 = vector.broadcast %cst_5 : f32 to vector<16x128xf32>
    %21 = arith.select %19, %9, %20 : vector<16x128xi1>, vector<16x128xf32>
    %cst_6 = arith.constant dense<0.000000e+00> : vector<128xf32>
    %22 = vector.multi_reduction <add>, %21, %cst_6 [0] : vector<16x128xf32> to vector<128xf32>
    %23 = vector.shape_cast %22 : vector<128xf32> to vector<1x128xf32>
    %c0_7 = arith.constant 0 : index
    %c0_8 = arith.constant 0 : index
    %24 = vector.load %arg3[%c0_7, %c0_8] : memref<1x128xf32, #tpu.memory_space<vmem>>, vector<1x128xf32>
    tpu.vector_store %arg3[%c0_7, %c0_8], %23 {strides = array<i32>} : memref<1x128xf32, #tpu.memory_space<vmem>>, vector<1x128xf32>,
    return
  }
  func.func @transform_0(%arg0: i32) -> (i32, i32) {
    %c0_i32 = arith.constant 0 : i32
    %c0_i32_0 = arith.constant 0 : i32
    return %arg0, %c0_i32 : i32, i32
  }
  func.func @transform_1(%arg0: i32) -> (i32, i32) {
    %c0_i32 = arith.constant 0 : i32
    %c0_i32_0 = arith.constant 0 : i32
    return %arg0, %c0_i32 : i32, i32
  }
  func.func @transform_2(%arg0: i32) -> (i32, i32) {
    %c0_i32 = arith.constant 0 : i32
    %c0_i32_0 = arith.constant 0 : i32
    return %arg0, %c0_i32 : i32, i32
  }
}

</mosaic_0001>

<bundles_post_ra>
// kernel: tpu_custom_call.1
= control target key start
LH: loop header
LB: loop body
LE: loop exit
PB: predicated region body
PF: predicated region fallthrough
CT: control target
= control target key end

     0   :  { %7 = vsyncpa [#allocation3], 0  ;;  %s254_s0 = inlined_call_operand.hbm [shape: f32[16,128], index: 0, kind: input, shape index: {}]   ;;  %s255_s1 = inlined_call_operand.hbm [shape: f32[16,128], index: 1, kind: input, shape index: {}]   ;;  %s256_s2 = inlined_call_operand.hbm [shape: f32[1,128], index: 2, kind: output, shape index: {}]  }
   0x1   :  { %8 = vsyncpa [#allocation6], 0 }
   0x2   :  { %9 = vsyncpa [#allocation4], 0  ;;  %s14_s11 = sshll.u32 %s254_s0, 4  ;;  %s218_s12 = smov [#allocation2]   ;;  %s15_s11 = int_to_ptr.hbm [resolvable:$true] %s14_s11 }
   0x3   :  { %s16_s13 = sshll.u32 %s218_s12, 4  ;;  %s27_s16 = sshll.u32 %s255_s1, 4  ;;  %s17_s13 = int_to_ptr.vmem [resolvable:$true] %s16_s13  ;;  %s28_s16 = int_to_ptr.hbm [resolvable:$true] %s27_s16 }
   0x4   :  { %s219_s17 = smov 128   ;;  %s220_s18 = smov 8  }
   0x5   :  { %22 = dma.hbm_to_vmem [thread:$0]  %s15_s11, 256, %s17_s13, [#allocation3], %s219_s17, %s219_s17, %s220_s18  }
   0x6   :  { %s221_s19 = smov [#allocation5]  }
   0x7   :  { %s29_s20 = sshll.u32 %s221_s19, 4  ;;  %s30_s20 = int_to_ptr.vmem [resolvable:$true] %s29_s20 }
   0x8   :  { %35 = dma.hbm_to_vmem [thread:$0]  %s28_s16, 256, %s30_s20, [#allocation6], %s219_s17, %s219_s17, %s220_s18  }
   0x9   :  { %212 = dma.done.wait [#allocation3], 256  }
   0xa   :  { %213 = vsyncadd [#allocation3], 4294967040 }
   0xb   :  { %214 = dma.done.wait [#allocation6], 256  }
   0xc   :  { %215 = vsyncadd [#allocation6], 4294967040  ;;  %v46_v0 = vld [vmem:[#allocation5] sm:$0xff]  ;;  %v47_v1 = vld [vmem:[#allocation5 + $0x8] sm:$0xff]  ;;  %v89_v2 = vlaneseq  ;;  %s222_s0 = smov [#allocation7]   ;;  %s120_s23 = sshll.u32 %s256_s2, 4  ;;  %s121_s23 = int_to_ptr.hbm [resolvable:$true] %s120_s23 }
   0xd   :  { %136 = vrcp.f32 %v46_v0  ;;  %vm55_vm0 = vweird.f32 %v46_v0  ;;  %v61_v7 = vand.u32 2147483648, %v46_v0  ;;  %v59_v10 = vand.u32 2147483647, %v46_v0  ;;  %v44_v12 = vld [vmem:[#allocation2] sm:$0xff]  ;;  %v45_v15 = vld [vmem:[#allocation2 + $0x8] sm:$0xff]  ;;  %s118_s1 = sshll.u32 %s222_s0, 4  ;;  %s119_s1 = int_to_ptr.vmem [resolvable:$true] %s118_s1 }
   0xe   :  { %138 = vrcp.f32 %v47_v1  ;;  %v90_v6 = vshrl.u32 %v89_v2, 7  ;;  %v76_v11 = vand.u32 2147483648, %v47_v1  ;;  %vm70_vm2 = vweird.f32 %v47_v1 }
   0xf   :  { %v74_v14 = vand.u32 2147483647, %v47_v1  ;;  %v62_v19 = vor.u32 1.1754944e-38, %v61_v7  ;;  %v93_v21 = vand.u32 127, %v89_v2  ;;  %v48_v22 = vsub.f32 %v44_v12, %v46_v0 }
  0x10   :  { %v91_v17 = vadd.s32 8, %v90_v6  ;;  %vm60_vm5 = vcmp.eq.f32.partialorder %v59_v10, 8.507059e+37  ;;  %v77_v24 = vor.u32 1.1754944e-38, %v76_v11  ;;  %v49_v25 = vsub.f32 %v45_v15, %v47_v1 }
  0x11   :  { %vm75_vm7 = vcmp.eq.f32.partialorder %v74_v14, 8.507059e+37  ;;  %v94_v27 = vmul.u32 128, %v90_v6 }
  0x12   :  { %v95_v29 = vmul.u32 128, %v91_v17 }
  0x13   :  { %v137_v3 = vpop.eup %136  ;;  %v99_v35 = vadd.s32 %v94_v27, %v93_v21 }
  0x14   :  { %v139_v4 = vpop.eup %138  ;;  %v51_v5 = vmul.f32 %v137_v3, %v46_v0  ;;  %vm56_vm1 = vweird.f32 %v137_v3  ;;  %v100_v37 = vadd.s32 %v95_v29, %v93_v21 }
  0x15   :  { %v66_v8 = vmul.f32 %v139_v4, %v47_v1  ;;  %vm71_vm3 = vweird.f32 %v139_v4  ;;  %vm245_vm4 = vmor %vm55_vm0, %vm56_vm1  ;;  %vm101_vm10 = vcmp.lt.s32.totalorder %v99_v35, 2048 }
  0x16   :  { %v52_v9 = vsub.f32 1.0, %v51_v5  ;;  %vm72_vm6 = vmor %vm70_vm2, %vm71_vm3  ;;  %vm102_vm11 = vcmp.lt.s32.totalorder %v100_v37, 2048 }
  0x17   :  { %v67_v13 = vsub.f32 1.0, %v66_v8 }
  0x18   :  { %v53_v16 = vmul.f32 %v137_v3, %v52_v9 }
  0x19   :  { %v68_v20 = vmul.f32 %v139_v4, %v67_v13 }
  0x1a   :  { %v54_v23 = vadd.f32 %v137_v3, %v53_v16 }
  0x1b   :  { %v69_v26 = vadd.f32 %v139_v4, %v68_v20 }
  0x1c   :  { %v58_v28 = vsel %vm245_vm4, %v137_v3, %v54_v23 }
  0x1d   :  { %v63_v30 = vsel %vm60_vm5, %v62_v19, %v58_v28  ;;  %v73_v31 = vsel %vm72_vm6, %v139_v4, %v69_v26 }
  0x1e   :  { %v64_v32 = vmul.f32 %v63_v30, %v48_v22  ;;  %v78_v33 = vsel %vm75_vm7, %v77_v24, %v73_v31 }
  0x1f   :  { %v79_v34 = vmul.f32 %v78_v33, %v49_v25 }
  0x20   :  { %v80_v36 = vand.u32 2147483647, %v64_v32 }
  0x21   :  { %v81_v38 = vand.u32 2147483647, %v79_v34 }
  0x22   :  { %vm82_vm8 = vcmp.ne.f32.partialorder %v80_v36, %v80_v36 }
  0x23   :  { %vm83_vm9 = vcmp.ne.f32.partialorder %v81_v38, %v81_v38  ;;  %v84_v39 = vsel %vm82_vm8, 0.0, %v80_v36 }
  0x24   :  { %v85_v40 = vsel %vm83_vm9, 0.0, %v81_v38  ;;  %v86_v41 = vmin.f32 %v84_v39, 3.4028235e+38 }
  0x25   :  { %v87_v42 = vmin.f32 %v85_v40, 3.4028235e+38 }
  0x26   :  { %v103_v43 = vsel %vm101_vm10, %v86_v41, 0.0 }
  0x27   :  { %v104_v44 = vsel %vm102_vm11, %v87_v42, 0.0 }
  0x28   :  { %v105_v45 = vadd.f32 %v104_v44, %v103_v43 }
  0x2a   :  { %v106_v46 = vrot.slane %v105_v45, 4 }
  0x2c   :  { %v107_v47 = vadd.f32 %v106_v46, %v105_v45 }
  0x2e   :  { %v108_v48 = vrot.slane %v107_v47, 2 }
  0x30   :  { %v109_v49 = vadd.f32 %v108_v48, %v107_v47 }
  0x32   :  { %v110_v50 = vrot.slane %v109_v49, 1 }
  0x34   :  { %v111_v51 = vadd.f32 %v110_v50, %v109_v49 }
  0x36   :  { %112 = vst [vmem:[#allocation7] sm:$0x1] %v111_v51 }
  0x37   :  { %123 = dma.vmem_to_hbm [thread:$0]  %s119_s1, 16, %s121_s23, [#allocation4]  }
  0x38   :  { %216 = dma.done.wait [#allocation4], 16  }
  0x39   :  { %217 = vsyncadd [#allocation4], 4294967280 }
  0x3a   :  { %128 = vsyncpa [#allocation3], 1 }
  0x3b   :  { %129 = vsyncpa [#allocation6], 1 }
  0x3c   :  { %130 = vsyncpa [#allocation4], 1 }

</bundles_post_ra>
